<compile_context>
chip_gen: v6e
topology: v6e:2x2x1
jax: 0.10.0
libtpu: 0.0.40
codegen_flags: <defaults>
</compile_context>

<pallas_src>
import functools
import math

import jax
import jax.numpy as jnp
from jax import lax
from jax.experimental import pallas as pl
from jax.experimental.pallas import tpu as pltpu


def _round_up(x, m):
    return ((x + m - 1) // m) * m


def _wide_mlp_kernel(x_ref, w1_ref, b1_ref, w2_ref, b2_ref, w3_ref, b3_ref, o_ref):
    """Processes one (TM, K) tile of rows through fc1->ReLU->fc2->ReLU->fc3.

    Weights are VMEM-resident (constant index_map) across the batch grid.
    All matmuls accumulate in f32 on the MXU. fc3 is computed as a
    (1, H) x (TM, H)^T contraction so the tile result lands as a lane-dense
    (1, TM) row instead of a masked (TM, 1) column store.
    """
    cdt = w1_ref.dtype  # compute dtype of matmul operands (f32 or bf16)

    # fc1 + ReLU (f32 accumulation).
    h1 = jnp.dot(x_ref[...], w1_ref[...], preferred_element_type=jnp.float32)
    h1 = jnp.maximum(h1 + b1_ref[...], 0.0)

    # fc2 + ReLU.
    h2 = jnp.dot(h1.astype(cdt), w2_ref[...], preferred_element_type=jnp.float32)
    h2 = jnp.maximum(h2 + b2_ref[...], 0.0)

    # fc3: w3 is a (1, H) row; contract over H -> (1, TM) lane-dense output row.
    out = lax.dot_general(
        w3_ref[...], h2.astype(cdt),
        dimension_numbers=(((1,), (1,)), ((), ())),
        preferred_element_type=jnp.float32,
    )
    o_ref[...] = (out + b3_ref[...]).astype(o_ref.dtype)


@functools.partial(jax.jit, static_argnames=("block_rows", "compute_dtype"))
def wide_mlp(x, w1, b1, w2, b2, w3, b3, *, block_rows=256, compute_dtype=None):
    """x: (B, input_size). Returns (B, 1) f32, matching WideMLP.forward semantics."""
    B, K = x.shape
    H = w1.shape[1]
    cdt = jnp.dtype(compute_dtype) if compute_dtype is not None else x.dtype
    f32 = jnp.float32

    # Lane/sublane-friendly padding: features to multiples of 128 lanes, batch to
    # a multiple of the row tile. Zero padding is numerically exact here (padded
    # bias entries are 0, so padded hidden units stay at ReLU(0) = 0).
    TM = block_rows
    K_p = _round_up(K, 128)
    H_p = _round_up(H, 128)
    B_p = _round_up(max(B, 1), TM)
    n_tiles = B_p // TM

    x_p = jnp.pad(x.astype(cdt), ((0, B_p - B), (0, K_p - K)))
    w1_p = jnp.pad(w1.astype(cdt), ((0, K_p - K), (0, H_p - H)))
    b1_p = jnp.pad(b1.reshape(1, -1).astype(f32), ((0, 0), (0, H_p - H)))
    w2_p = jnp.pad(w2.astype(cdt), ((0, H_p - H), (0, H_p - H)))
    b2_p = jnp.pad(b2.reshape(1, -1).astype(f32), ((0, 0), (0, H_p - H)))
    w3_p = jnp.pad(w3.reshape(1, -1).astype(cdt), ((0, 0), (0, H_p - H)))  # (1, H_p)
    b3_p = b3.reshape(1, 1).astype(f32)

    # VMEM budget: double-buffered blocks + resident weights + f32 intermediates.
    itemsize = jnp.dtype(cdt).itemsize
    block_bytes = (
        TM * K_p * itemsize          # x tile
        + K_p * H_p * itemsize       # w1
        + H_p * H_p * itemsize       # w2
        + H_p * itemsize             # w3 row
        + 2 * H_p * 4 + 4            # b1, b2, b3 (f32)
        + TM * 4                     # out tile (f32)
    )
    interm_bytes = 2 * TM * H_p * 4  # h1 / h2 live f32 tiles
    vmem_needed = 2 * block_bytes + interm_bytes
    vmem_limit = int(min(max(vmem_needed * 3 // 2, 32 * 1024 * 1024), 96 * 1024 * 1024))

    cost = pl.CostEstimate(
        flops=2 * B * (K * H + H * H + H),
        transcendentals=0,
        bytes_accessed=(x.size + w1.size + w2.size + w3.size) * itemsize
        + (b1.size + b2.size + b3.size + B) * 4,
    )

    out_row = pl.pallas_call(
        _wide_mlp_kernel,
        out_shape=jax.ShapeDtypeStruct((1, B_p), f32),
        grid_spec=pltpu.PrefetchScalarGridSpec(
            num_scalar_prefetch=0,
            grid=(n_tiles,),
            in_specs=[
                pl.BlockSpec((TM, K_p), lambda i: (i, 0)),   # x: streamed per batch tile
                pl.BlockSpec((K_p, H_p), lambda i: (0, 0)),  # w1: VMEM-resident
                pl.BlockSpec((1, H_p), lambda i: (0, 0)),    # b1
                pl.BlockSpec((H_p, H_p), lambda i: (0, 0)),  # w2: VMEM-resident
                pl.BlockSpec((1, H_p), lambda i: (0, 0)),    # b2
                pl.BlockSpec((1, H_p), lambda i: (0, 0)),    # w3 (row)
                pl.BlockSpec((1, 1), lambda i: (0, 0)),      # b3
            ],
            out_specs=pl.BlockSpec((1, TM), lambda i: (0, i)),  # lane-dense output slab
        ),
        compiler_params=pltpu.CompilerParams(
            dimension_semantics=("parallel",),
            vmem_limit_bytes=vmem_limit,
        ),
        cost_estimate=cost,
    )(x_p, w1_p, b1_p, w2_p, b2_p, w3_p, b3_p)

    # (1, B_p) lane-dense row -> (B, 1) column, dropping batch padding.
    return out_row.reshape(B_p, 1)[:B]


def init_params(key, input_size, hidden_size, dtype=jnp.float32):
    """Synthetic params, nn.Linear-style init; weights stored (in, out)."""
    k1, k2, k3, k4, k5, k6 = jax.random.split(key, 6)
    s1 = 1.0 / math.sqrt(input_size)
    s2 = 1.0 / math.sqrt(hidden_size)
    w1 = jax.random.uniform(k1, (input_size, hidden_size), dtype, -s1, s1)
    b1 = jax.random.uniform(k2, (hidden_size,), dtype, -s1, s1)
    w2 = jax.random.uniform(k3, (hidden_size, hidden_size), dtype, -s2, s2)
    b2 = jax.random.uniform(k4, (hidden_size,), dtype, -s2, s2)
    w3 = jax.random.uniform(k5, (hidden_size, 1), dtype, -s2, s2)
    b3 = jax.random.uniform(k6, (1,), dtype, -s2, s2)
    return w1, b1, w2, b2, w3, b3


def mlp_reference(x, w1, b1, w2, b2, w3, b3, compute_dtype=None):
    """Plain-JAX reference mirroring the kernel's casting (operand dtype, f32 accum)."""
    cdt = jnp.dtype(compute_dtype) if compute_dtype is not None else x.dtype
    f32 = jnp.float32
    h1 = jnp.dot(x.astype(cdt), w1.astype(cdt), preferred_element_type=f32)
    h1 = jnp.maximum(h1 + b1.reshape(1, -1).astype(f32), 0.0)
    h2 = jnp.dot(h1.astype(cdt), w2.astype(cdt), preferred_element_type=f32)
    h2 = jnp.maximum(h2 + b2.reshape(1, -1).astype(f32), 0.0)
    out = jnp.dot(h2.astype(cdt), w3.astype(cdt), preferred_element_type=f32)
    return out + b3.reshape(1, 1).astype(f32)


if __name__ == "__main__":
    # --- test 1: small shapes, f32 compute, tight numerical check ------------
    batch, input_size, hidden_size = 8, 16, 32
    kx, kp = jax.random.split(jax.random.PRNGKey(0))
    x = jax.random.normal(kx, (batch, input_size), jnp.float32)
    params = init_params(kp, input_size, hidden_size)

    out = jax.block_until_ready(wide_mlp(x, *params))
    ref = mlp_reference(x, *params)
    assert out.shape == (batch, 1)
    assert jnp.allclose(out, ref, atol=1e-4, rtol=1e-4), (
        f"f32 mismatch: max abs err = {jnp.max(jnp.abs(out - ref))}")

    # --- test 2: larger shapes, bf16 compute, multi-tile batch grid ----------
    batch2, in2, hid2 = 512, 256, 512
    kx2, kp2 = jax.random.split(jax.random.PRNGKey(1))
    x2 = jax.random.normal(kx2, (batch2, in2), jnp.float32)
    params2 = init_params(kp2, in2, hid2)

    out2 = jax.block_until_ready(
        wide_mlp(x2, *params2, block_rows=256, compute_dtype=jnp.bfloat16))
    ref2 = mlp_reference(x2, *params2, compute_dtype=jnp.bfloat16)
    assert out2.shape == (batch2, 1)
    assert jnp.allclose(out2, ref2, atol=5e-2, rtol=5e-2), (
        f"bf16 mismatch: max abs err = {jnp.max(jnp.abs(out2 - ref2))}")

    print("KERNEL_OK")
</pallas_src>

<mosaic_0001>
module attributes {stable_mosaic.version = 11 : i64} {
  func.func @_wide_mlp_kernel(%arg0: i32, %arg1: memref<256x128xf32, #tpu.memory_space<vmem>>, %arg2: memref<128x128xf32, #tpu.memory_space<vmem>>, %arg3: memref<1x128xf32, #tpu.memory_space<vmem>>, %arg4: memref<128x128xf32, #tpu.memory_space<vmem>>, %arg5: memref<1x128xf32, #tpu.memory_space<vmem>>, %arg6: memref<1x128xf32, #tpu.memory_space<vmem>>, %arg7: memref<1x1xf32, #tpu.memory_space<vmem>>, %arg8: memref<1x256xf32, #tpu.memory_space<vmem>>) attributes {dimension_semantics = [#tpu.dimension_semantics<parallel>], iteration_bounds = array<i64: 1>, scalar_prefetch = 0 : i64, scratch_operands = 0 : i64, tpu.core_type = #tpu.core_type<tc>, window_params = [{transform_indices = @transform_0, window_bounds = array<i64: 256, 128>}, {pipeline_mode = #tpu.pipeline_mode<synchronous>, transform_indices = @transform_1, window_bounds = array<i64: 128, 128>}, {pipeline_mode = #tpu.pipeline_mode<synchronous>, transform_indices = @transform_2, window_bounds = array<i64: 1, 128>}, {pipeline_mode = #tpu.pipeline_mode<synchronous>, transform_indices = @transform_3, window_bounds = array<i64: 128, 128>}, {pipeline_mode = #tpu.pipeline_mode<synchronous>, transform_indices = @transform_4, window_bounds = array<i64: 1, 128>}, {pipeline_mode = #tpu.pipeline_mode<synchronous>, transform_indices = @transform_5, window_bounds = array<i64: 1, 128>}, {pipeline_mode = #tpu.pipeline_mode<synchronous>, transform_indices = @transform_6, window_bounds = array<i64: 1, 1>}, {transform_indices = @transform_7, window_bounds = array<i64: 1, 256>}]} {
    %c0 = arith.constant 0 : index
    %c0_0 = arith.constant 0 : index
    %0 = vector.load %arg1[%c0, %c0_0] : memref<256x128xf32, #tpu.memory_space<vmem>>, vector<256x128xf32>
    %c0_1 = arith.constant 0 : index
    %c0_2 = arith.constant 0 : index
    %1 = vector.load %arg2[%c0_1, %c0_2] : memref<128x128xf32, #tpu.memory_space<vmem>>, vector<128x128xf32>
    %cst = arith.constant dense<0.000000e+00> : vector<256x128xf32>
    %2 = tpu.matmul %0, %1, %cst {dimension_numbers = #tpu.dot_dimension_numbers<[1], [0], [0], [1], [0, 0, 1, 1], [], []>} : vector<256x128xf32>, vector<128x128xf32>, vector<256x128xf32> -> vector<256x128xf32>
    %c0_3 = arith.constant 0 : index
    %c0_4 = arith.constant 0 : index
    %3 = vector.load %arg3[%c0_3, %c0_4] : memref<1x128xf32, #tpu.memory_space<vmem>>, vector<1x128xf32>
    %4 = vector.broadcast %3 : vector<1x128xf32> to vector<256x128xf32>
    %5 = arith.addf %2, %4 : vector<256x128xf32>
    %cst_5 = arith.constant 0.000000e+00 : f32
    %6 = vector.broadcast %cst_5 : f32 to vector<256x128xf32>
    %7 = arith.maximumf %5, %6 : vector<256x128xf32>
    %c0_6 = arith.constant 0 : index
    %c0_7 = arith.constant 0 : index
    %8 = vector.load %arg4[%c0_6, %c0_7] : memref<128x128xf32, #tpu.memory_space<vmem>>, vector<128x128xf32>
    %cst_8 = arith.constant dense<0.000000e+00> : vector<256x128xf32>
    %9 = tpu.matmul %7, %8, %cst_8 {dimension_numbers = #tpu.dot_dimension_numbers<[1], [0], [0], [1], [0, 0, 1, 1], [], []>} : vector<256x128xf32>, vector<128x128xf32>, vector<256x128xf32> -> vector<256x128xf32>
    %c0_9 = arith.constant 0 : index
    %c0_10 = arith.constant 0 : index
    %10 = vector.load %arg5[%c0_9, %c0_10] : memref<1x128xf32, #tpu.memory_space<vmem>>, vector<1x128xf32>
    %11 = vector.broadcast %10 : vector<1x128xf32> to vector<256x128xf32>
    %12 = arith.addf %9, %11 : vector<256x128xf32>
    %cst_11 = arith.constant 0.000000e+00 : f32
    %13 = vector.broadcast %cst_11 : f32 to vector<256x128xf32>
    %14 = arith.maximumf %12, %13 : vector<256x128xf32>
    %c0_12 = arith.constant 0 : index
    %c0_13 = arith.constant 0 : index
    %15 = vector.load %arg6[%c0_12, %c0_13] : memref<1x128xf32, #tpu.memory_space<vmem>>, vector<1x128xf32>
    %cst_14 = arith.constant dense<0.000000e+00> : vector<1x256xf32>
    %16 = tpu.matmul %15, %14, %cst_14 {dimension_numbers = #tpu.dot_dimension_numbers<[1], [1], [0], [0], [0, 0, 1, 0], [], []>} : vector<1x128xf32>, vector<256x128xf32>, vector<1x256xf32> -> vector<1x256xf32>
    %c0_15 = arith.constant 0 : index
    %c0_16 = arith.constant 0 : index
    %17 = vector.load %arg7[%c0_15, %c0_16] : memref<1x1xf32, #tpu.memory_space<vmem>>, vector<1x1xf32>
    %18 = vector.broadcast %17 : vector<1x1xf32> to vector<1x256xf32>
    %19 = arith.addf %16, %18 : vector<1x256xf32>
    %c0_17 = arith.constant 0 : index
    %c0_18 = arith.constant 0 : index
    %20 = vector.load %arg8[%c0_17, %c0_18] : memref<1x256xf32, #tpu.memory_space<vmem>>, vector<1x256xf32>
    tpu.vector_store %arg8[%c0_17, %c0_18], %19 {strides = array<i32>} : memref<1x256xf32, #tpu.memory_space<vmem>>, vector<1x256xf32>,
    return
  }
  func.func @transform_0(%arg0: i32) -> (i32, i32) {
    %c0_i32 = arith.constant 0 : i32
    %c0_i32_0 = arith.constant 0 : i32
    return %arg0, %c0_i32 : i32, i32
  }
  func.func @transform_1(%arg0: i32) -> (i32, i32) {
    %c0_i32 = arith.constant 0 : i32
    %c0_i32_0 = arith.constant 0 : i32
    %c0_i32_1 = arith.constant 0 : i32
    return %c0_i32, %c0_i32_0 : i32, i32
  }
  func.func @transform_2(%arg0: i32) -> (i32, i32) {
    %c0_i32 = arith.constant 0 : i32
    %c0_i32_0 = arith.constant 0 : i32
    %c0_i32_1 = arith.constant 0 : i32
    return %c0_i32, %c0_i32_0 : i32, i32
  }
  func.func @transform_3(%arg0: i32) -> (i32, i32) {
    %c0_i32 = arith.constant 0 : i32
    %c0_i32_0 = arith.constant 0 : i32
    %c0_i32_1 = arith.constant 0 : i32
    return %c0_i32, %c0_i32_0 : i32, i32
  }
  func.func @transform_4(%arg0: i32) -> (i32, i32) {
    %c0_i32 = arith.constant 0 : i32
    %c0_i32_0 = arith.constant 0 : i32
    %c0_i32_1 = arith.constant 0 : i32
    return %c0_i32, %c0_i32_0 : i32, i32
  }
  func.func @transform_5(%arg0: i32) -> (i32, i32) {
    %c0_i32 = arith.constant 0 : i32
    %c0_i32_0 = arith.constant 0 : i32
    %c0_i32_1 = arith.constant 0 : i32
    return %c0_i32, %c0_i32_0 : i32, i32
  }
  func.func @transform_6(%arg0: i32) -> (i32, i32) {
    %c0_i32 = arith.constant 0 : i32
    %c0_i32_0 = arith.constant 0 : i32
    %c0_i32_1 = arith.constant 0 : i32
    return %c0_i32, %c0_i32_0 : i32, i32
  }
  func.func @transform_7(%arg0: i32) -> (i32, i32) {
    %c0_i32 = arith.constant 0 : i32
    %c0_i32_0 = arith.constant 0 : i32
    return %c0_i32, %arg0 : i32, i32
  }
}

</mosaic_0001>

<bundles_post_ra>
// kernel: wide_mlp.1
= control target key start
LH: loop header
LB: loop body
LE: loop exit
PB: predicated region body
PF: predicated region fallthrough
CT: control target
= control target key end

     0   :  { %s1390_s1 = inlined_call_operand.vmem [shape: f32[128,128], index: 1, kind: input, shape index: {}]   ;;  %s1391_s0 = inlined_call_operand.vmem [shape: f32[256,128], index: 0, kind: input, shape index: {}]   ;;  %s1392_s3 = inlined_call_operand.vmem [shape: f32[128,128], index: 3, kind: input, shape index: {}]   ;;  %s1393_s2 = inlined_call_operand.vmem [shape: f32[1,128], index: 2, kind: input, shape index: {}]   ;;  %s1394_s5 = inlined_call_operand.vmem [shape: f32[1,128], index: 5, kind: input, shape index: {}]   ;;  %s1395_s6 = inlined_call_operand.<no memory space> [shape: f32[1,1], index: 6, kind: input, shape index: {}]   ;;  %s1396_s4 = inlined_call_operand.vmem [shape: f32[1,128], index: 4, kind: input, shape index: {}]   ;;  %s1397_s7 = inlined_call_operand.vmem [shape: f32[1,256], index: 7, kind: output, shape index: {}]  }
   0x1   :  { %v75_v0 = vld [vmem:[%s1390_s1 + $0x78] sm:$0xff]  ;;  %v74_v1 = vld [vmem:[%s1390_s1 + $0x70] sm:$0xff]  ;;  %v73_v2 = vld [vmem:[%s1390_s1 + $0x68] sm:$0xff] }
   0x2   :  { %861 = vmatprep.subr.mxu0 %v75_v0  ;;  %v72_v3 = vld [vmem:[%s1390_s1 + $0x60] sm:$0xff]  ;;  %v71_v5 = vld [vmem:[%s1390_s1 + $0x58] sm:$0xff]  ;;  %v70_v6 = vld [vmem:[%s1390_s1 + $0x50] sm:$0xff] }
   0x3   :  { %862 = vmatpush3.msra.mxu0 %v75_v0  ;;  %v28_v4 = vld [vmem:[%s1391_s0] sm:$0xff]  ;;  %v69_v7 = vld [vmem:[%s1390_s1 + $0x48] sm:$0xff]  ;;  %v67_v9 = vld [vmem:[%s1390_s1 + $0x38] sm:$0xff] }
   0x4   :  { %863 = vmatprep.subr.mxu0 %v74_v1  ;;  %893 = vmatprep.mubr.f32.mxu0 %v28_v4  ;;  %v68_v8 = vld [vmem:[%s1390_s1 + $0x40] sm:$0xff]  ;;  %v66_v10 = vld [vmem:[%s1390_s1 + $0x30] sm:$0xff]  ;;  %v355_v11 = vld [vmem:[%s1392_s3 + $0x78] sm:$0xff] }
   0x5   :  { %864 = vmatpush3.msra.mxu0 %v74_v1  ;;  %v354_v12 = vld [vmem:[%s1392_s3 + $0x70] sm:$0xff]  ;;  %941 = vmatprep.subr.mxu1 %v355_v11  ;;  %v65_v13 = vld [vmem:[%s1390_s1 + $0x28] sm:$0xff]  ;;  %v64_v15 = vld [vmem:[%s1390_s1 + $0x20] sm:$0xff] }
   0x6   :  { %865 = vmatprep.subr.mxu0 %v73_v2  ;;  %942 = vmatpush3.msra.mxu1 %v355_v11  ;;  %v353_v14 = vld [vmem:[%s1392_s3 + $0x68] sm:$0xff]  ;;  %v352_v16 = vld [vmem:[%s1392_s3 + $0x60] sm:$0xff]  ;;  %v63_v17 = vld [vmem:[%s1390_s1 + $0x18] sm:$0xff] }
   0x7   :  { %866 = vmatpush3.msra.mxu0 %v73_v2  ;;  %943 = vmatprep.subr.mxu1 %v354_v12  ;;  %v351_v18 = vld [vmem:[%s1392_s3 + $0x58] sm:$0xff]  ;;  %v62_v19 = vld [vmem:[%s1390_s1 + $0x10] sm:$0xff]  ;;  %v61_v21 = vld [vmem:[%s1390_s1 + $0x8] sm:$0xff] }
   0x8   :  { %867 = vmatprep.subr.mxu0 %v72_v3  ;;  %944 = vmatpush3.msra.mxu1 %v354_v12  ;;  %v350_v20 = vld [vmem:[%s1392_s3 + $0x50] sm:$0xff]  ;;  %v349_v22 = vld [vmem:[%s1392_s3 + $0x48] sm:$0xff]  ;;  %v60_v23 = vld [vmem:[%s1390_s1] sm:$0xff] }
   0x9   :  { %868 = vmatpush3.msra.mxu0 %v72_v3  ;;  %945 = vmatprep.subr.mxu1 %v353_v14  ;;  %v348_v24 = vld [vmem:[%s1392_s3 + $0x40] sm:$0xff]  ;;  %v29_v25 = vld [vmem:[%s1391_s0 + $0x8] sm:$0xff]  ;;  %v347_v26 = vld [vmem:[%s1392_s3 + $0x38] sm:$0xff] }
   0xa   :  { %869 = vmatprep.subr.mxu0 %v71_v5  ;;  %946 = vmatpush3.msra.mxu1 %v353_v14  ;;  %v30_v27 = vld [vmem:[%s1391_s0 + $0x10] sm:$0xff]  ;;  %v31_v29 = vld [vmem:[%s1391_s0 + $0x18] sm:$0xff]  ;;  %v345_v30 = vld [vmem:[%s1392_s3 + $0x28] sm:$0xff] }
   0xb   :  { %870 = vmatpush3.msra.mxu0 %v71_v5  ;;  %947 = vmatprep.subr.mxu1 %v352_v16  ;;  %v346_v28 = vld [vmem:[%s1392_s3 + $0x30] sm:$0xff]  ;;  %v32_v31 = vld [vmem:[%s1391_s0 + $0x20] sm:$0xff]  ;;  %v33_v33 = vld [vmem:[%s1391_s0 + $0x28] sm:$0xff] }
   0xc   :  { %871 = vmatprep.subr.mxu0 %v70_v6  ;;  %948 = vmatpush3.msra.mxu1 %v352_v16  ;;  %v344_v32 = vld [vmem:[%s1392_s3 + $0x20] sm:$0xff]  ;;  %v34_v34 = vld [vmem:[%s1391_s0 + $0x30] sm:$0xff]  ;;  %v35_v35 = vld [vmem:[%s1391_s0 + $0x38] sm:$0xff] }
   0xd   :  { %872 = vmatpush3.msra.mxu0 %v70_v6  ;;  %949 = vmatprep.subr.mxu1 %v351_v18  ;;  %v36_v36 = vld [vmem:[%s1391_s0 + $0x40] sm:$0xff]  ;;  %v37_v37 = vld [vmem:[%s1391_s0 + $0x48] sm:$0xff]  ;;  %v38_v38 = vld [vmem:[%s1391_s0 + $0x50] sm:$0xff] }
   0xe   :  { %873 = vmatprep.subr.mxu0 %v69_v7  ;;  %950 = vmatpush3.msra.mxu1 %v351_v18  ;;  %v39_v39 = vld [vmem:[%s1391_s0 + $0x58] sm:$0xff]  ;;  %v40_v40 = vld [vmem:[%s1391_s0 + $0x60] sm:$0xff]  ;;  %v41_v41 = vld [vmem:[%s1391_s0 + $0x68] sm:$0xff] }
   0xf   :  { %874 = vmatpush3.msra.mxu0 %v69_v7  ;;  %951 = vmatprep.subr.mxu1 %v350_v20  ;;  %v42_v42 = vld [vmem:[%s1391_s0 + $0x70] sm:$0xff]  ;;  %v43_v43 = vld [vmem:[%s1391_s0 + $0x78] sm:$0xff]  ;;  %v44_v44 = vld [vmem:[%s1391_s0 + $0x80] sm:$0xff] }
  0x10   :  { %875 = vmatprep.subr.mxu0 %v68_v8  ;;  %952 = vmatpush3.msra.mxu1 %v350_v20  ;;  %v45_v45 = vld [vmem:[%s1391_s0 + $0x88] sm:$0xff]  ;;  %v46_v46 = vld [vmem:[%s1391_s0 + $0x90] sm:$0xff]  ;;  %v47_v47 = vld [vmem:[%s1391_s0 + $0x98] sm:$0xff] }
  0x11   :  { %876 = vmatpush3.msra.mxu0 %v68_v8  ;;  %953 = vmatprep.subr.mxu1 %v349_v22  ;;  %v48_v48 = vld [vmem:[%s1391_s0 + $0xa0] sm:$0xff]  ;;  %v49_v49 = vld [vmem:[%s1391_s0 + $0xa8] sm:$0xff]  ;;  %v50_v50 = vld [vmem:[%s1391_s0 + $0xb0] sm:$0xff] }
  0x12   :  { %877 = vmatprep.subr.mxu0 %v67_v9  ;;  %954 = vmatpush3.msra.mxu1 %v349_v22  ;;  %v51_v51 = vld [vmem:[%s1391_s0 + $0xb8] sm:$0xff]  ;;  %v52_v52 = vld [vmem:[%s1391_s0 + $0xc0] sm:$0xff]  ;;  %v53_v53 = vld [vmem:[%s1391_s0 + $0xc8] sm:$0xff] }
  0x13   :  { %878 = vmatpush3.msra.mxu0 %v67_v9  ;;  %955 = vmatprep.subr.mxu1 %v348_v24  ;;  %v54_v54 = vld [vmem:[%s1391_s0 + $0xd0] sm:$0xff]  ;;  %v55_v55 = vld [vmem:[%s1391_s0 + $0xd8] sm:$0xff]  ;;  %v56_v56 = vld [vmem:[%s1391_s0 + $0xe0] sm:$0xff] }
  0x14   :  { %879 = vmatprep.subr.mxu0 %v66_v10  ;;  %956 = vmatpush3.msra.mxu1 %v348_v24  ;;  %v57_v57 = vld [vmem:[%s1391_s0 + $0xe8] sm:$0xff]  ;;  %v58_v58 = vld [vmem:[%s1391_s0 + $0xf0] sm:$0xff]  ;;  %v59_v59 = vld [vmem:[%s1391_s0 + $0xf8] sm:$0xff] }
  0x15   :  { %880 = vmatpush3.msra.mxu0 %v66_v10  ;;  %957 = vmatprep.subr.mxu1 %v347_v26  ;;  %v343_v60 = vld [vmem:[%s1392_s3 + $0x18] sm:$0xff]  ;;  %v342_v61 = vld [vmem:[%s1392_s3 + $0x10] sm:$0xff]  ;;  %v341_v62 = vld [vmem:[%s1392_s3 + $0x8] sm:$0xff] }
  0x16   :  { %881 = vmatprep.subr.mxu0 %v65_v13  ;;  %958 = vmatpush3.msra.mxu1 %v347_v26  ;;  %v340_v63 = vld [vmem:[%s1392_s3] sm:$0xff] }
  0x17   :  { %882 = vmatpush3.msra.mxu0 %v65_v13  ;;  %959 = vmatprep.subr.mxu1 %v346_v28  ;;  %v1261_v0 = vld [vmem:[%s1393_s2] ss:$0 sm:$0xff] }
  0x18   :  { %883 = vmatprep.subr.mxu0 %v64_v15  ;;  %960 = vmatpush3.msra.mxu1 %v346_v28 }
  0x19   :  { %884 = vmatpush3.msra.mxu0 %v64_v15  ;;  %961 = vmatprep.subr.mxu1 %v345_v30 }
  0x1a   :  { %885 = vmatprep.subr.mxu0 %v63_v17  ;;  %962 = vmatpush3.msra.mxu1 %v345_v30 }
  0x1b   :  { %886 = vmatpush3.msra.mxu0 %v63_v17  ;;  %963 = vmatprep.subr.mxu1 %v344_v32 }
  0x1c   :  { %887 = vmatprep.subr.mxu0 %v62_v19  ;;  %964 = vmatpush3.msra.mxu1 %v344_v32 }
  0x1d   :  { %888 = vmatpush3.msra.mxu0 %v62_v19  ;;  %965 = vmatprep.subr.mxu1 %v343_v60 }
  0x1e   :  { %889 = vmatprep.subr.mxu0 %v61_v21  ;;  %966 = vmatpush3.msra.mxu1 %v343_v60 }
  0x1f   :  { %890 = vmatpush3.msra.mxu0 %v61_v21  ;;  %967 = vmatprep.subr.mxu1 %v342_v61 }
  0x20   :  { %891 = vmatprep.subr.mxu0 %v60_v23  ;;  %968 = vmatpush3.msra.mxu1 %v342_v61 }
  0x21   :  { %892 = vmatpush3.msra.mxu0 %v60_v23  ;;  %969 = vmatprep.subr.mxu1 %v341_v62 }
  0x22   :  { %894 = vmatmul.mubr.f32.vlgmr.msra.gmra.mxu0 %v29_v25  ;;  %970 = vmatpush3.msra.mxu1 %v341_v62 }
  0x23   :  { %896 = vmatprep.mubr.f32.mxu0 %v30_v27  ;;  %971 = vmatprep.subr.mxu1 %v340_v63 }
  0x24   :  { %972 = vmatpush3.msra.mxu1 %v340_v63 }
  0x26   :  { %897 = vmatmul.mubr.f32.gmra.mxu0 %v31_v29 }
  0x27   :  { %899 = vmatprep.mubr.f32.mxu0 %v32_v31 }
  0x2a   :  { %900 = vmatmul.mubr.f32.gmra.mxu0 %v33_v33 }
  0x2b   :  { %902 = vmatprep.mubr.f32.mxu0 %v34_v34 }
  0x2e   :  { %903 = vmatmul.mubr.f32.gmra.mxu0 %v35_v35 }
  0x2f   :  { %905 = vmatprep.mubr.f32.mxu0 %v36_v36 }
  0x32   :  { %906 = vmatmul.mubr.f32.gmra.mxu0 %v37_v37 }
  0x33   :  { %908 = vmatprep.mubr.f32.mxu0 %v38_v38 }
  0x36   :  { %909 = vmatmul.mubr.f32.gmra.mxu0 %v39_v39 }
  0x37   :  { %911 = vmatprep.mubr.f32.mxu0 %v40_v40 }
  0x3a   :  { %912 = vmatmul.mubr.f32.gmra.mxu0 %v41_v41 }
  0x3b   :  { %914 = vmatprep.mubr.f32.mxu0 %v42_v42 }
  0x3e   :  { %915 = vmatmul.mubr.f32.gmra.mxu0 %v43_v43 }
  0x3f   :  { %917 = vmatprep.mubr.f32.mxu0 %v44_v44 }
  0x42   :  { %918 = vmatmul.mubr.f32.gmra.mxu0 %v45_v45 }
  0x43   :  { %920 = vmatprep.mubr.f32.mxu0 %v46_v46 }
  0x46   :  { %921 = vmatmul.mubr.f32.gmra.mxu0 %v47_v47 }
  0x47   :  { %923 = vmatprep.mubr.f32.mxu0 %v48_v48 }
  0x4a   :  { %924 = vmatmul.mubr.f32.gmra.mxu0 %v49_v49 }
  0x4b   :  { %926 = vmatprep.mubr.f32.mxu0 %v50_v50 }
  0x4e   :  { %927 = vmatmul.mubr.f32.gmra.mxu0 %v51_v51 }
  0x4f   :  { %929 = vmatprep.mubr.f32.mxu0 %v52_v52 }
  0x52   :  { %930 = vmatmul.mubr.f32.gmra.mxu0 %v53_v53 }
  0x53   :  { %932 = vmatprep.mubr.f32.mxu0 %v54_v54 }
  0x56   :  { %933 = vmatmul.mubr.f32.gmra.mxu0 %v55_v55 }
  0x57   :  { %935 = vmatprep.mubr.f32.mxu0 %v56_v56 }
  0x5a   :  { %936 = vmatmul.mubr.f32.gmra.mxu0 %v57_v57 }
  0x5b   :  { %938 = vmatprep.mubr.f32.mxu0 %v58_v58 }
  0x5e   :  { %939 = vmatmul.mubr.f32.gmra.mxu0 %v59_v59 }
  0xe2   :  { %v895_v1 = vpop.f32.mrf.mxu0 }
  0xe3   :  { %v155_v2 = vadd.f32 %v895_v1, %v1261_v0 }
  0xe4   :  { %v149_v3 = vpop.f32.mrf.mxu0 }
  0xe5   :  { %v150_v4 = vadd.f32 %v1261_v0, %v149_v3  ;;  %v309_v7 = vmax.f32 %v155_v2, 0.0 }
  0xe6   :  { %v898_v5 = vpop.f32.mrf.mxu0 }
  0xe7   :  { %v308_v6 = vmax.f32 %v150_v4, 0.0  ;;  %v165_v8 = vadd.f32 %v898_v5, %v1261_v0 }
  0xe8   :  { %v159_v9 = vpop.f32.mrf.mxu0 }
  0xe9   :  { %v160_v10 = vadd.f32 %v1261_v0, %v159_v9  ;;  %973 = vmatprep.mubr.f32.mxu1 %v308_v6  ;;  %v311_v13 = vmax.f32 %v165_v8, 0.0 }
  0xea   :  { %v901_v11 = vpop.f32.mrf.mxu0  ;;  %974 = vmatmul.mubr.f32.vlgmr.msra.gmra.mxu1 %v309_v7 }
  0xeb   :  { %v310_v12 = vmax.f32 %v160_v10, 0.0  ;;  %v175_v14 = vadd.f32 %v901_v11, %v1261_v0 }
  0xec   :  { %v169_v15 = vpop.f32.mrf.mxu0 }
  0xed   :  { %v170_v16 = vadd.f32 %v1261_v0, %v169_v15  ;;  %976 = vmatprep.mubr.f32.mxu1 %v310_v12  ;;  %v313_v19 = vmax.f32 %v175_v14, 0.0 }
  0xee   :  { %v904_v17 = vpop.f32.mrf.mxu0  ;;  %977 = vmatmul.mubr.f32.gmra.mxu1 %v311_v13 }
  0xef   :  { %v312_v18 = vmax.f32 %v170_v16, 0.0  ;;  %v185_v20 = vadd.f32 %v904_v17, %v1261_v0 }
  0xf0   :  { %v179_v21 = vpop.f32.mrf.mxu0 }
  0xf1   :  { %v180_v22 = vadd.f32 %v1261_v0, %v179_v21  ;;  %979 = vmatprep.mubr.f32.mxu1 %v312_v18  ;;  %v315_v25 = vmax.f32 %v185_v20, 0.0 }
  0xf2   :  { %v907_v23 = vpop.f32.mrf.mxu0  ;;  %980 = vmatmul.mubr.f32.gmra.mxu1 %v313_v19 }
  0xf3   :  { %v314_v24 = vmax.f32 %v180_v22, 0.0  ;;  %v195_v26 = vadd.f32 %v907_v23, %v1261_v0 }
  0xf4   :  { %v189_v27 = vpop.f32.mrf.mxu0 }
  0xf5   :  { %v190_v28 = vadd.f32 %v1261_v0, %v189_v27  ;;  %982 = vmatprep.mubr.f32.mxu1 %v314_v24  ;;  %v317_v31 = vmax.f32 %v195_v26, 0.0 }
  0xf6   :  { %v910_v29 = vpop.f32.mrf.mxu0  ;;  %983 = vmatmul.mubr.f32.gmra.mxu1 %v315_v25 }
  0xf7   :  { %v316_v30 = vmax.f32 %v190_v28, 0.0  ;;  %v205_v32 = vadd.f32 %v910_v29, %v1261_v0 }
  0xf8   :  { %v199_v33 = vpop.f32.mrf.mxu0 }
  0xf9   :  { %v200_v34 = vadd.f32 %v1261_v0, %v199_v33  ;;  %985 = vmatprep.mubr.f32.mxu1 %v316_v30  ;;  %v319_v37 = vmax.f32 %v205_v32, 0.0 }
  0xfa   :  { %v913_v35 = vpop.f32.mrf.mxu0  ;;  %986 = vmatmul.mubr.f32.gmra.mxu1 %v317_v31 }
  0xfb   :  { %v318_v36 = vmax.f32 %v200_v34, 0.0  ;;  %v215_v38 = vadd.f32 %v913_v35, %v1261_v0  ;;  %v1298_v34 = vld [vmem:[%s1394_s5] sm:$0x1] }
  0xfc   :  { %v209_v39 = vpop.f32.mrf.mxu0  ;;  %859 = vmatprep.mubr.f32.mxu0 %v1298_v34 }
  0xfd   :  { %v210_v40 = vadd.f32 %v1261_v0, %v209_v39  ;;  %988 = vmatprep.mubr.f32.mxu1 %v318_v36  ;;  %v321_v43 = vmax.f32 %v215_v38, 0.0 }
  0xfe   :  { %v916_v41 = vpop.f32.mrf.mxu0  ;;  %989 = vmatmul.mubr.f32.gmra.mxu1 %v319_v37  ;;  %v1024_v37 = vmov 0  }
  0xff   :  { %v320_v42 = vmax.f32 %v210_v40, 0.0  ;;  %v225_v44 = vadd.f32 %v916_v41, %v1261_v0  ;;  %1023 = vset.pattern.permute.xlu0 %v1024_v37 }
 0x100   :  { %v219_v45 = vpop.f32.mrf.mxu0 }
 0x101   :  { %v220_v46 = vadd.f32 %v1261_v0, %v219_v45  ;;  %991 = vmatprep.mubr.f32.mxu1 %v320_v42  ;;  %v323_v49 = vmax.f32 %v225_v44, 0.0 }
 0x102   :  { %v919_v47 = vpop.f32.mrf.mxu0  ;;  %992 = vmatmul.mubr.f32.gmra.mxu1 %v321_v43 }
 0x103   :  { %v322_v48 = vmax.f32 %v220_v46, 0.0  ;;  %v235_v50 = vadd.f32 %v919_v47, %v1261_v0 }
 0x104   :  { %v229_v51 = vpop.f32.mrf.mxu0 }
 0x105   :  { %v230_v52 = vadd.f32 %v1261_v0, %v229_v51  ;;  %994 = vmatprep.mubr.f32.mxu1 %v322_v48  ;;  %v325_v55 = vmax.f32 %v235_v50, 0.0 }
 0x106   :  { %v922_v53 = vpop.f32.mrf.mxu0  ;;  %995 = vmatmul.mubr.f32.gmra.mxu1 %v323_v49 }
 0x107   :  { %v324_v54 = vmax.f32 %v230_v52, 0.0  ;;  %v245_v56 = vadd.f32 %v922_v53, %v1261_v0 }
 0x108   :  { %v239_v57 = vpop.f32.mrf.mxu0 }
 0x109   :  { %v240_v58 = vadd.f32 %v1261_v0, %v239_v57  ;;  %997 = vmatprep.mubr.f32.mxu1 %v324_v54  ;;  %v327_v61 = vmax.f32 %v245_v56, 0.0 }
 0x10a   :  { %v925_v59 = vpop.f32.mrf.mxu0  ;;  %998 = vmatmul.mubr.f32.gmra.mxu1 %v325_v55 }
 0x10b   :  { %v326_v60 = vmax.f32 %v240_v58, 0.0  ;;  %v255_v62 = vadd.f32 %v925_v59, %v1261_v0 }
 0x10c   :  { %v249_v63 = vpop.f32.mrf.mxu0 }
 0x10d   :  { %v250_v1 = vadd.f32 %v1261_v0, %v249_v63  ;;  %1000 = vmatprep.mubr.f32.mxu1 %v326_v60  ;;  %v329_v4 = vmax.f32 %v255_v62, 0.0 }
 0x10e   :  { %v928_v2 = vpop.f32.mrf.mxu0  ;;  %1001 = vmatmul.mubr.f32.gmra.mxu1 %v327_v61 }
 0x10f   :  { %v328_v3 = vmax.f32 %v250_v1, 0.0  ;;  %v265_v5 = vadd.f32 %v928_v2, %v1261_v0 }
 0x110   :  { %v259_v6 = vpop.f32.mrf.mxu0 }
 0x111   :  { %v260_v7 = vadd.f32 %v1261_v0, %v259_v6  ;;  %1003 = vmatprep.mubr.f32.mxu1 %v328_v3  ;;  %v331_v10 = vmax.f32 %v265_v5, 0.0 }
 0x112   :  { %v931_v8 = vpop.f32.mrf.mxu0  ;;  %1004 = vmatmul.mubr.f32.gmra.mxu1 %v329_v4  ;;  %v1337_v4 = vld [vmem:[%s1396_s4] ss:$0 sm:$0xff] }
 0x113   :  { %v330_v9 = vmax.f32 %v260_v7, 0.0  ;;  %v275_v11 = vadd.f32 %v931_v8, %v1261_v0 }
 0x114   :  { %v269_v12 = vpop.f32.mrf.mxu0 }
 0x115   :  { %v270_v13 = vadd.f32 %v1261_v0, %v269_v12  ;;  %1006 = vmatprep.mubr.f32.mxu1 %v330_v9  ;;  %v333_v16 = vmax.f32 %v275_v11, 0.0 }
 0x116   :  { %v934_v14 = vpop.f32.mrf.mxu0  ;;  %1007 = vmatmul.mubr.f32.gmra.mxu1 %v331_v10 }
 0x117   :  { %v332_v15 = vmax.f32 %v270_v13, 0.0  ;;  %v285_v17 = vadd.f32 %v934_v14, %v1261_v0 }
 0x118   :  { %v279_v18 = vpop.f32.mrf.mxu0 }
 0x119   :  { %v280_v19 = vadd.f32 %v1261_v0, %v279_v18  ;;  %1009 = vmatprep.mubr.f32.mxu1 %v332_v15  ;;  %v335_v22 = vmax.f32 %v285_v17, 0.0 }
 0x11a   :  { %v937_v20 = vpop.f32.mrf.mxu0  ;;  %1010 = vmatmul.mubr.f32.gmra.mxu1 %v333_v16 }
 0x11b   :  { %v334_v21 = vmax.f32 %v280_v19, 0.0  ;;  %v295_v23 = vadd.f32 %v937_v20, %v1261_v0 }
 0x11c   :  { %v289_v24 = vpop.f32.mrf.mxu0 }
 0x11d   :  { %v290_v25 = vadd.f32 %v1261_v0, %v289_v24  ;;  %1012 = vmatprep.mubr.f32.mxu1 %v334_v21  ;;  %v337_v28 = vmax.f32 %v295_v23, 0.0 }
 0x11e   :  { %v940_v26 = vpop.f32.mrf.mxu0  ;;  %1013 = vmatmul.mubr.f32.gmra.mxu1 %v335_v22 }
 0x11f   :  { %v336_v27 = vmax.f32 %v290_v25, 0.0  ;;  %v305_v29 = vadd.f32 %v940_v26, %v1261_v0 }
 0x120   :  { %v299_v30 = vpop.f32.mrf.mxu0 }
 0x121   :  { %v300_v31 = vadd.f32 %v1261_v0, %v299_v30  ;;  %1015 = vmatprep.mubr.f32.mxu1 %v336_v27  ;;  %v339_v33 = vmax.f32 %v305_v29, 0.0  ;;  %v12_v0 = vstv %s1395_s6 }
 0x122   :  { %1016 = vmatmul.mubr.f32.gmra.mxu1 %v337_v28  ;;  %13 = vst [vmem:[#allocation2] sm:$0x1] %v12_v0 }
 0x123   :  { %v338_v32 = vmax.f32 %v300_v31, 0.0 }
 0x125   :  { %1018 = vmatprep.mubr.f32.mxu1 %v338_v32 }
 0x126   :  { %1019 = vmatmul.mubr.f32.gmra.mxu1 %v339_v33 }
 0x129   :  { %v621_v42 = vld [vmem:[#allocation2] sm:$0x1] }
 0x12a   :  { %624 = vperm.xlu0 %1023, %v621_v42  }
 0x1aa   :  { %v1300_v35 = vpop.f32.mrf.mxu1 }
 0x1ac   :  { %v1303_v36 = vpop.f32.mrf.mxu1 }
 0x1ae   :  { %v1308_v38 = vpop.f32.mrf.mxu1 }
 0x1b0   :  { %v1310_v39 = vpop.f32.mrf.mxu1 }
 0x1b2   :  { %v1312_v40 = vpop.f32.mrf.mxu1 }
 0x1b4   :  { %v1314_v41 = vpop.f32.mrf.mxu1 }
 0x1b6   :  { %v1316_v43 = vpop.f32.mrf.mxu1 }
 0x1b8   :  { %v1318_v44 = vpop.f32.mrf.mxu1 }
 0x1ba   :  { %v987_v45 = vpop.f32.mrf.mxu1 }
 0x1bb   :  { %v475_v31 = vadd.f32 %v987_v45, %v1337_v4 }
 0x1bc   :  { %v1320_v46 = vpop.f32.mrf.mxu1 }
 0x1bd   :  { %v597_v0 = vmax.f32 %v475_v31, 0.0  ;;  %v470_v42 = vadd.f32 %v1337_v4, %v1320_v46 }
 0x1be   :  { %v990_v47 = vpop.f32.mrf.mxu1 }
 0x1bf   :  { %v485_v23 = vadd.f32 %v990_v47, %v1337_v4 }
 0x1c0   :  { %v479_v48 = vpop.f32.mrf.mxu1 }
 0x1c1   :  { %v599_v27 = vmax.f32 %v485_v23, 0.0  ;;  %v480_v28 = vadd.f32 %v1337_v4, %v479_v48 }
 0x1c2   :  { %v993_v49 = vpop.f32.mrf.mxu1 }
 0x1c3   :  { %v495_v15 = vadd.f32 %v993_v49, %v1337_v4  ;;  %v598_v32 = vmax.f32 %v480_v28, 0.0  ;;  %v465_v49 = vadd.f32 %v1316_v43, %v1337_v4 }
 0x1c4   :  { %v489_v50 = vpop.f32.mrf.mxu1 }
 0x1c5   :  { %v601_v19 = vmax.f32 %v495_v15, 0.0  ;;  %v490_v20 = vadd.f32 %v1337_v4, %v489_v50  ;;  %v596_v50 = vmax.f32 %v470_v42, 0.0 }
 0x1c6   :  { %v996_v51 = vpop.f32.mrf.mxu1 }
 0x1c7   :  { %v505_v5 = vadd.f32 %v996_v51, %v1337_v4  ;;  %v600_v24 = vmax.f32 %v490_v20, 0.0 }
 0x1c8   :  { %v499_v52 = vpop.f32.mrf.mxu1 }
 0x1c9   :  { %v603_v11 = vmax.f32 %v505_v5, 0.0  ;;  %v500_v12 = vadd.f32 %v1337_v4, %v499_v52  ;;  %v595_v52 = vmax.f32 %v465_v49, 0.0 }
 0x1ca   :  { %v1322_v53 = vpop.f32.mrf.mxu1 }
 0x1cb   :  { %v602_v16 = vmax.f32 %v500_v12, 0.0  ;;  %v627_v12 = vlaneseq }
 0x1cc   :  { %v1324_v54 = vpop.f32.mrf.mxu1 }
 0x1cd   :  { %vm722_vm0 = vcmp.lt.s32.totalorder %v627_v12, 256 }
 0x1ce   :  { %v1326_v55 = vpop.f32.mrf.mxu1 }
 0x1d0   :  { %v1328_v56 = vpop.f32.mrf.mxu1 }
 0x1d2   :  { %v1330_v57 = vpop.f32.mrf.mxu1 }
 0x1d3   :  { %v535_v46 = vadd.f32 %v1330_v57, %v1337_v4  ;;  %v525_v57 = vadd.f32 %v1326_v55, %v1337_v4  ;;  %v515_v55 = vadd.f32 %v1322_v53, %v1337_v4 }
 0x1d4   :  { %v1332_v58 = vpop.f32.mrf.mxu1 }
 0x1d5   :  { %v607_v5 = vmax.f32 %v525_v57, 0.0 }
 0x1d6   :  { %v1008_v59 = vpop.f32.mrf.mxu1 }
 0x1d7   :  { %v545_v47 = vadd.f32 %v1008_v59, %v1337_v4 }
 0x1d8   :  { %v539_v60 = vpop.f32.mrf.mxu1 }
 0x1d9   :  { %v611_v45 = vmax.f32 %v545_v47, 0.0  ;;  %v540_v51 = vadd.f32 %v1337_v4, %v539_v60  ;;  %v530_v60 = vadd.f32 %v1337_v4, %v1332_v58  ;;  %v520_v58 = vadd.f32 %v1337_v4, %v1328_v56 }
 0x1da   :  { %v1011_v61 = vpop.f32.mrf.mxu1  ;;  %v510_v56 = vadd.f32 %v1337_v4, %v1324_v54 }
 0x1db   :  { %v555_v29 = vadd.f32 %v1011_v61, %v1337_v4  ;;  %v460_v61 = vadd.f32 %v1337_v4, %v1318_v44  ;;  %v610_v59 = vmax.f32 %v540_v51, 0.0  ;;  %v450_v44 = vadd.f32 %v1337_v4, %v1314_v41 }
 0x1dc   :  { %v549_v62 = vpop.f32.mrf.mxu1  ;;  %v440_v41 = vadd.f32 %v1337_v4, %v1310_v39  ;;  %v430_v39 = vadd.f32 %v1337_v4, %v1303_v36 }
 0x1dd   :  { %v613_v33 = vmax.f32 %v555_v29, 0.0  ;;  %v550_v37 = vadd.f32 %v1337_v4, %v549_v62  ;;  %v455_v62 = vadd.f32 %v1312_v40, %v1337_v4  ;;  %v594_v43 = vmax.f32 %v460_v61, 0.0 }
 0x1de   :  { %v1014_v63 = vpop.f32.mrf.mxu1  ;;  %v445_v40 = vadd.f32 %v1308_v38, %v1337_v4  ;;  %v435_v38 = vadd.f32 %v1300_v35, %v1337_v4  ;;  %v588_v53 = vmax.f32 %v430_v39, 0.0  ;;  %v628_v35 = vshrl.u32 %v627_v12, 7 }
 0x1df   :  { %v565_v21 = vadd.f32 %v1014_v63, %v1337_v4  ;;  %v612_v48 = vmax.f32 %v550_v37, 0.0  ;;  %v609_v63 = vmax.f32 %v535_v46, 0.0 }
 0x1e0   :  { %v559_v1 = vpop.f32.mrf.mxu1 }
 0x1e1   :  { %v615_v25 = vmax.f32 %v565_v21, 0.0  ;;  %v560_v26 = vadd.f32 %v1337_v4, %v559_v1  ;;  %v593_v1 = vmax.f32 %v455_v62, 0.0 }
 0x1e2   :  { %v1017_v2 = vpop.f32.mrf.mxu1 }
 0x1e3   :  { %v575_v13 = vadd.f32 %v1017_v2, %v1337_v4  ;;  %v614_v30 = vmax.f32 %v560_v26, 0.0  ;;  %v608_v2 = vmax.f32 %v530_v60, 0.0 }
 0x1e4   :  { %v569_v3 = vpop.f32.mrf.mxu1 }
 0x1e5   :  { %v617_v17 = vmax.f32 %v575_v13, 0.0  ;;  %v570_v18 = vadd.f32 %v1337_v4, %v569_v3  ;;  %v592_v3 = vmax.f32 %v450_v44, 0.0  ;;  %v629_v13 = vsub.s32 0, %v628_v35 }
 0x1e6   :  { %v1020_v6 = vpop.f32.mrf.mxu1 }
 0x1e7   :  { %v585_v7 = vadd.f32 %v1020_v6, %v1337_v4  ;;  %v616_v22 = vmax.f32 %v570_v18, 0.0  ;;  %v591_v6 = vmax.f32 %v445_v40, 0.0 }
 0x1e8   :  { %v579_v8 = vpop.f32.mrf.mxu1 }
 0x1e9   :  { %v619_v9 = vmax.f32 %v585_v7, 0.0  ;;  %v580_v10 = vadd.f32 %v1337_v4, %v579_v8  ;;  %v606_v7 = vmax.f32 %v520_v58, 0.0  ;;  %v590_v8 = vmax.f32 %v440_v41, 0.0 }
 0x1eb   :  { %v618_v14 = vmax.f32 %v580_v10, 0.0  ;;  %827 = vmatprep.subr.mxu0 %v619_v9  ;;  %v605_v9 = vmax.f32 %v515_v55, 0.0  ;;  %v589_v10 = vmax.f32 %v435_v38, 0.0 }
 0x1ec   :  { %828 = vmatpush3.xpose.msra.mxu0 %v603_v11  ;;  %v604_v11 = vmax.f32 %v510_v56, 0.0 }
 0x1ed   :  { %829 = vmatprep.subr.mxu0 %v618_v14  ;;  %v1025_v14 = vmov 1966171168  }
 0x1ee   :  { %v706_v15 = vunpack.c.l.s4 %v1025_v14 }
 0x1f0   :  { %830 = vmatpush3.xpose.msra.mxu0 %v602_v16  ;;  %v625_v16 = vpop.permute.xlu0 %624 }
 0x1f1   :  { %831 = vmatprep.subr.mxu0 %v617_v17  ;;  %v630_v54 = vrot.slane %v625_v16, %v629_v13  ;;  %v707_v17 = vunpack.c.0.s8 %v706_v15 }
 0x1f3   :  { %v710_v36 = vsub.s32 %v707_v17, %v628_v35 }
 0x1f4   :  { %832 = vmatpush3.xpose.msra.mxu0 %v601_v19 }
 0x1f5   :  { %833 = vmatprep.subr.mxu0 %v616_v22 }
 0x1f8   :  { %834 = vmatpush3.xpose.msra.mxu0 %v600_v24 }
 0x1f9   :  { %835 = vmatprep.subr.mxu0 %v615_v25 }
 0x1fc   :  { %836 = vmatpush3.xpose.msra.mxu0 %v599_v27 }
 0x1fd   :  { %837 = vmatprep.subr.mxu0 %v614_v30 }
 0x200   :  { %838 = vmatpush3.xpose.msra.mxu0 %v598_v32 }
 0x201   :  { %839 = vmatprep.subr.mxu0 %v613_v33 }
 0x204   :  { %840 = vmatpush3.xpose.msra.mxu0 %v597_v0 }
 0x205   :  { %841 = vmatprep.subr.mxu0 %v612_v48 }
 0x208   :  { %842 = vmatpush3.xpose.msra.mxu0 %v596_v50 }
 0x209   :  { %843 = vmatprep.subr.mxu0 %v611_v45 }
 0x20c   :  { %844 = vmatpush3.xpose.msra.mxu0 %v595_v52 }
 0x20d   :  { %845 = vmatprep.subr.mxu0 %v610_v59 }
 0x210   :  { %846 = vmatpush3.xpose.msra.mxu0 %v594_v43 }
 0x211   :  { %847 = vmatprep.subr.mxu0 %v609_v63 }
 0x214   :  { %848 = vmatpush3.xpose.msra.mxu0 %v593_v1 }
 0x215   :  { %849 = vmatprep.subr.mxu0 %v608_v2 }
 0x218   :  { %850 = vmatpush3.xpose.msra.mxu0 %v592_v3 }
 0x219   :  { %851 = vmatprep.subr.mxu0 %v607_v5 }
 0x21c   :  { %852 = vmatpush3.xpose.msra.mxu0 %v591_v6 }
 0x21d   :  { %853 = vmatprep.subr.mxu0 %v606_v7 }
 0x220   :  { %854 = vmatpush3.xpose.msra.mxu0 %v590_v8 }
 0x221   :  { %855 = vmatprep.subr.mxu0 %v605_v9 }
 0x224   :  { %856 = vmatpush3.xpose.msra.mxu0 %v589_v10 }
 0x225   :  { %857 = vmatprep.subr.mxu0 %v604_v11 }
 0x228   :  { %858 = vmatpush3.xpose.msra.mxu0 %v588_v53 }
 0x22b   :  { %860 = vmatmul.mubr.f32.vlgmr.msra.gmra.mxu0 %v1298_v34 }
 0x2eb   :  { %v697_v18 = vpop.f32.mrf.mxu0 }
 0x2ec   :  { %v698_v20 = vadd.f32 %v697_v18, %v630_v54 }
 0x2ed   :  { %v699_v19 = vpop.f32.mrf.mxu0 }
 0x2ee   :  { %v700_v21 = vadd.f32 %v699_v19, %v630_v54 }
 0x2f0   :  { %v704_v4 = vcombine.low %v698_v20, %v700_v21 }
 0x2f2   :  { %v711_v22 = vrot.slane %v704_v4, %v710_v36 }
 0x2f4   :  { %v718_v23 = vrot.slane %v711_v22, %v710_v36 }
 0x2f6   :  { %724 = vst.msk [vmem:[%s1397_s7] sm:$0x3] %vm722_vm0, %v718_v23 }

</bundles_post_ra>
